<compile_context>
chip_gen: v7x
topology: tpu7x:2x2x1
jax: 0.10.0
libtpu: 0.0.40
codegen_flags: <defaults>
</compile_context>

<pallas_src>
import math

import jax
import jax.numpy as jnp
from jax.experimental import pallas as pl
from jax.experimental.pallas import tpu as pltpu

EPS = 1e-6


# ----------------------------------------------------------------------------
# Helpers
# ----------------------------------------------------------------------------
def _vmem_limit_bytes():
    """Conservative scoped-VMEM limit that adapts to the chip (v7x has 64 MiB)."""
    try:
        cap = pltpu.get_tpu_info().vmem_capacity_bytes
        return int(min(100 * 1024 * 1024, (cap * 3) // 4))
    except Exception:
        return None  # fall back to the compiler default


_VMEM_LIMIT = _vmem_limit_bytes()


def _pick_tile(n, target):
    """Largest power-of-two divisor of n that is <= target (keeps blocks exact)."""
    for cand in (512, 256, 128, 64, 32, 16, 8):
        if cand <= target and n % cand == 0:
            return cand
    return n


def _layernorm(x, a, b):
    """Annotated-Transformer LayerNorm: unbiased std (D-1), eps added to std."""
    d = x.shape[-1]
    mean = jnp.mean(x, axis=-1, keepdims=True)
    diff = x - mean
    std = jnp.sqrt(jnp.sum(diff * diff, axis=-1, keepdims=True) / (d - 1))
    return a * diff / (std + EPS) + b


# ----------------------------------------------------------------------------
# Attention sublayer kernel: x + MHA(LN(x), kv, kv, mask)
# ----------------------------------------------------------------------------
def _make_attn_kernel(num_heads, d_model, tile_q, cross, cdt, approx_recip):
    dk = d_model // num_heads
    scale = 1.0 / math.sqrt(dk)

    def kernel(*refs):
        if cross:
            (x_ref, mem_ref, mask_ref, a_ref, b_ref,
             wq_ref, bq_ref, wkv_ref, bkv_ref, wo_ref, bo_ref,
             o_ref, kv_scr, ctx_scr) = refs
        else:
            (x_ref, mask_ref, a_ref, b_ref,
             wq_ref, bq_ref, wkv_ref, bkv_ref, wo_ref, bo_ref,
             o_ref, xn_scr, kv_scr, ctx_scr) = refs

        qt = pl.program_id(1)

        # --- once per batch row: K|V projection (one full-width dot) --------
        @pl.when(qt == 0)
        def _():
            if cross:
                kv_src = mem_ref[0].astype(cdt)                    # (S, D)
            else:
                xn = _layernorm(x_ref[0], a_ref[...], b_ref[...])  # (T, D) f32
                xn_scr[...] = xn.astype(cdt)
                kv_src = xn_scr[...]
            kv = jnp.dot(kv_src, wkv_ref[...],
                         preferred_element_type=jnp.float32) + bkv_ref[...]
            kv_scr[...] = kv.astype(cdt)                           # (S, 2D)

        # --- per query tile --------------------------------------------------
        if cross:
            res = x_ref[0]                                         # (TQ, D) f32
            xq_n = _layernorm(res, a_ref[...], b_ref[...]).astype(cdt)
        else:
            row0 = pl.multiple_of(qt * tile_q, tile_q)
            res = x_ref[0, pl.ds(row0, tile_q), :]                 # (TQ, D) f32
            xq_n = xn_scr[pl.ds(row0, tile_q), :]                  # (TQ, D) cdt

        # Additive mask bias, built once per tile (not per head).
        bias = jnp.where(mask_ref[0] == 0.0, -1e9, 0.0)            # (TQ, S) f32

        # Full-width Q projection: one (TQ,D)x(D,D) dot.
        q_full = jnp.dot(xq_n, wq_ref[...],
                         preferred_element_type=jnp.float32) + bq_ref[...]

        # Per-head attention core on dk-wide lane views only.
        for h in range(num_heads):
            lo = h * dk
            qh = q_full[:, lo:lo + dk].astype(cdt)                 # (TQ, dk)
            kh = kv_scr[:, lo:lo + dk]                             # (S, dk)
            vh = kv_scr[:, d_model + lo:d_model + lo + dk]         # (S, dk)
            scores = jax.lax.dot_general(
                qh, kh, (((1,), (1,)), ((), ())),
                preferred_element_type=jnp.float32) * scale + bias  # (TQ, S)
            m = jnp.max(scores, axis=-1, keepdims=True)
            e = jnp.exp(scores - m)
            denom = jnp.sum(e, axis=-1, keepdims=True)
            # Defer 1/denom to the (TQ, dk) context (cheaper than scaling the
            # (TQ, S) probabilities); approx recip -> EUP slot in bf16 mode.
            ctx = jnp.dot(e.astype(cdt), vh,
                          preferred_element_type=jnp.float32)
            ctx = ctx * pl.reciprocal(denom, approx=approx_recip)
            ctx_scr[:, lo:lo + dk] = ctx.astype(cdt)

        # Fused output projection: one (TQ,D)x(D,D) dot over all heads.
        out = jnp.dot(ctx_scr[...], wo_ref[...],
                      preferred_element_type=jnp.float32) + bo_ref[...]
        o_ref[0] = (res + out).astype(o_ref.dtype)

    return kernel


def attn_sublayer(x, ln_a, ln_b, p, mask, num_heads, memory=None,
                  compute_dtype=jnp.float32):
    """x + MHA(LayerNorm(x), kv, kv, mask), fused in one pallas_call."""
    B, T, D = x.shape
    assert D % num_heads == 0
    cross = memory is not None
    S = memory.shape[1] if cross else T
    cdt = compute_dtype
    approx_recip = (cdt != jnp.float32)

    tq = _pick_tile(T, 256)
    n_qt = T // tq

    # Wrapper-side weight prep (free): concat K|V weights, cast MXU operands.
    wq = p["wq"].astype(cdt)
    wkv = jnp.concatenate([p["wk"], p["wv"]], axis=1).astype(cdt)   # (D, 2D)
    wo = p["wo"].astype(cdt)
    bq = p["bq"]
    bkv = jnp.concatenate([p["bk"], p["bv"]], axis=1)               # (1, 2D)
    bo = p["bo"]

    const = lambda b, q: (0, 0)
    if cross:
        x_spec = pl.BlockSpec((1, tq, D), lambda b, q: (b, q, 0))   # tile only
    else:
        x_spec = pl.BlockSpec((1, T, D), lambda b, q: (b, 0, 0))    # resident row
    mask_spec = pl.BlockSpec((1, tq, S), lambda b, q: (b, q, 0))
    lnv = pl.BlockSpec((1, D), const)

    in_specs = [x_spec]
    inputs = [x]
    if cross:
        in_specs.append(pl.BlockSpec((1, S, D), lambda b, q: (b, 0, 0)))
        inputs.append(memory)
    in_specs += [mask_spec, lnv, lnv,
                 pl.BlockSpec((D, D), const), pl.BlockSpec((1, D), const),
                 pl.BlockSpec((D, 2 * D), const), pl.BlockSpec((1, 2 * D), const),
                 pl.BlockSpec((D, D), const), pl.BlockSpec((1, D), const)]
    inputs += [mask, ln_a, ln_b, wq, bq, wkv, bkv, wo, bo]

    scratch = []
    if not cross:
        scratch.append(pltpu.VMEM((T, D), cdt))          # LN(x), cached per row
    scratch += [pltpu.VMEM((S, 2 * D), cdt),             # K|V projections
                pltpu.VMEM((tq, D), cdt)]                # per-tile ctx slab

    flops = int(B * (2 * T * D * D + 2 * S * D * 2 * D + 2 * T * D * D
                     + 4 * T * S * D))
    bytes_accessed = int(4 * (2 * B * T * D + (B * S * D if cross else 0)
                              + B * T * S) + jnp.dtype(cdt).itemsize * 4 * D * D)
    cost = pl.CostEstimate(flops=flops,
                           transcendentals=int(B * num_heads * T * S),
                           bytes_accessed=bytes_accessed)

    kernel = _make_attn_kernel(num_heads, D, tq, cross, cdt, approx_recip)

    return pl.pallas_call(
        kernel,
        out_shape=jax.ShapeDtypeStruct((B, T, D), x.dtype),
        grid=(B, n_qt),
        in_specs=in_specs,
        out_specs=pl.BlockSpec((1, tq, D), lambda b, q: (b, q, 0)),
        scratch_shapes=scratch,
        compiler_params=pltpu.CompilerParams(
            dimension_semantics=("parallel", "arbitrary"),
            vmem_limit_bytes=_VMEM_LIMIT),
        cost_estimate=cost,
    )(*inputs)


# ----------------------------------------------------------------------------
# FFN sublayer kernel: x + max(LN(x) @ w1 + b1, 0) @ w2 + b2
# ----------------------------------------------------------------------------
def _make_ffn_kernel(cdt):
    def kernel(x_ref, a_ref, b_ref, w1_ref, b1_ref, w2_ref, b2_ref, o_ref,
               xn_scr, acc_scr):
        ft = pl.program_id(1)

        @pl.when(ft == 0)
        def _():
            xn = _layernorm(x_ref[...], a_ref[...], b_ref[...])
            xn_scr[...] = xn.astype(cdt)
            acc_scr[...] = jnp.zeros_like(acc_scr)

        h = jnp.dot(xn_scr[...], w1_ref[...],
                    preferred_element_type=jnp.float32) + b1_ref[...]
        h = jnp.maximum(h, 0.0)
        acc_scr[...] += jnp.dot(h.astype(cdt), w2_ref[...],
                                preferred_element_type=jnp.float32)

        @pl.when(ft == pl.num_programs(1) - 1)
        def _():
            o_ref[...] = (x_ref[...] + acc_scr[...] + b2_ref[...]).astype(o_ref.dtype)

    return kernel


def ffn_sublayer(x, ln_a, ln_b, p, compute_dtype=jnp.float32):
    """x + FFN(LayerNorm(x)), fused; rows and the hidden dim F both tiled."""
    B, T, D = x.shape
    F = p["w1"].shape[1]
    n_rows = B * T
    x2 = x.reshape(n_rows, D)
    cdt = compute_dtype

    tr = _pick_tile(n_rows, 512)
    tf = _pick_tile(F, 512)
    r_steps = n_rows // tr
    f_steps = F // tf

    w1 = p["w1"].astype(cdt)
    w2 = p["w2"].astype(cdt)

    cost = pl.CostEstimate(
        flops=int(4 * n_rows * D * F), transcendentals=0,
        bytes_accessed=int(4 * (2 * n_rows * D + F + D)
                           + jnp.dtype(cdt).itemsize * 2 * D * F))

    out = pl.pallas_call(
        _make_ffn_kernel(cdt),
        out_shape=jax.ShapeDtypeStruct((n_rows, D), x.dtype),
        grid=(r_steps, f_steps),
        in_specs=[
            pl.BlockSpec((tr, D), lambda r, f: (r, 0)),
            pl.BlockSpec((1, D), lambda r, f: (0, 0)),
            pl.BlockSpec((1, D), lambda r, f: (0, 0)),
            pl.BlockSpec((D, tf), lambda r, f: (0, f)),
            pl.BlockSpec((1, tf), lambda r, f: (0, f)),
            pl.BlockSpec((tf, D), lambda r, f: (f, 0)),
            pl.BlockSpec((1, D), lambda r, f: (0, 0)),
        ],
        out_specs=pl.BlockSpec((tr, D), lambda r, f: (r, 0)),
        scratch_shapes=[pltpu.VMEM((tr, D), cdt),          # LN(x) row tile
                        pltpu.VMEM((tr, D), jnp.float32)],  # F-reduction acc
        compiler_params=pltpu.CompilerParams(
            dimension_semantics=("parallel", "arbitrary"),
            vmem_limit_bytes=_VMEM_LIMIT),
        cost_estimate=cost,
    )(x2, ln_a, ln_b, w1, p["b1"], w2, p["b2"])
    return out.reshape(B, T, D)


# ----------------------------------------------------------------------------
# DecoderLayer forward
# ----------------------------------------------------------------------------
def decoder_layer(x, memory, src_mask, tgt_mask, params, num_heads,
                  compute_dtype=jnp.float32):
    # sublayer[0]: x = x + SelfAttn(LN(x), tgt_mask)
    x = attn_sublayer(x, params["ln0_a"], params["ln0_b"],
                      params["self_attn"], tgt_mask, num_heads,
                      compute_dtype=compute_dtype)
    # sublayer[1]: x = x + SrcAttn(LN(x), memory, src_mask)
    x = attn_sublayer(x, params["ln1_a"], params["ln1_b"],
                      params["src_attn"], src_mask, num_heads, memory=memory,
                      compute_dtype=compute_dtype)
    # sublayer[2]: x = x + FFN(LN(x))
    return ffn_sublayer(x, params["ln2_a"], params["ln2_b"], params["ffn"],
                        compute_dtype=compute_dtype)


# ----------------------------------------------------------------------------
# Pure-JAX reference (correctness check)
# ----------------------------------------------------------------------------
def ref_layernorm(x, a, b):
    mean = x.mean(-1, keepdims=True)
    diff = x - mean
    std = jnp.sqrt((diff * diff).sum(-1, keepdims=True) / (x.shape[-1] - 1))
    return a[0] * diff / (std + EPS) + b[0]


def ref_mha(qx, kvx, mask, p, H):
    q = qx @ p["wq"] + p["bq"][0]
    k = kvx @ p["wk"] + p["bk"][0]
    v = kvx @ p["wv"] + p["bv"][0]
    B, T, D = q.shape
    S = k.shape[1]
    dk = D // H
    qh = q.reshape(B, T, H, dk).transpose(0, 2, 1, 3)
    kh = k.reshape(B, S, H, dk).transpose(0, 2, 1, 3)
    vh = v.reshape(B, S, H, dk).transpose(0, 2, 1, 3)
    scores = jnp.einsum("bhtd,bhsd->bhts", qh, kh) / math.sqrt(dk)
    scores = jnp.where(mask[:, None] == 0.0, -1e9, scores)
    attn = jax.nn.softmax(scores, axis=-1)
    out = jnp.einsum("bhts,bhsd->bhtd", attn, vh)
    out = out.transpose(0, 2, 1, 3).reshape(B, T, D)
    return out @ p["wo"] + p["bo"][0]


def ref_decoder_layer(x, memory, src_mask, tgt_mask, p, H):
    xn = ref_layernorm(x, p["ln0_a"], p["ln0_b"])
    x = x + ref_mha(xn, xn, tgt_mask, p["self_attn"], H)
    xn = ref_layernorm(x, p["ln1_a"], p["ln1_b"])
    x = x + ref_mha(xn, memory, src_mask, p["src_attn"], H)
    xn = ref_layernorm(x, p["ln2_a"], p["ln2_b"])
    h = jnp.maximum(xn @ p["ffn"]["w1"] + p["ffn"]["b1"][0], 0.0)
    return x + h @ p["ffn"]["w2"] + p["ffn"]["b2"][0]


# ----------------------------------------------------------------------------
def make_params(key, d_model, d_ff):
    ks = jax.random.split(key, 26)

    def attn_params(k8):
        def w(k):
            return jax.random.normal(k, (d_model, d_model), jnp.float32) * 0.05

        def b(k):
            return jax.random.normal(k, (1, d_model), jnp.float32) * 0.01

        return {"wq": w(k8[0]), "bq": b(k8[1]),
                "wk": w(k8[2]), "bk": b(k8[3]),
                "wv": w(k8[4]), "bv": b(k8[5]),
                "wo": w(k8[6]), "bo": b(k8[7])}

    def ln(ka, kb):
        return (1.0 + 0.1 * jax.random.normal(ka, (1, d_model), jnp.float32),
                0.05 * jax.random.normal(kb, (1, d_model), jnp.float32))

    ln0_a, ln0_b = ln(ks[16], ks[17])
    ln1_a, ln1_b = ln(ks[18], ks[19])
    ln2_a, ln2_b = ln(ks[20], ks[21])
    return {
        "ln0_a": ln0_a, "ln0_b": ln0_b,
        "ln1_a": ln1_a, "ln1_b": ln1_b,
        "ln2_a": ln2_a, "ln2_b": ln2_b,
        "self_attn": attn_params(ks[0:8]),
        "src_attn": attn_params(ks[8:16]),
        "ffn": {
            "w1": jax.random.normal(ks[22], (d_model, d_ff), jnp.float32) * 0.05,
            "b1": jax.random.normal(ks[23], (1, d_ff), jnp.float32) * 0.01,
            "w2": jax.random.normal(ks[24], (d_ff, d_model), jnp.float32) * 0.05,
            "b2": jax.random.normal(ks[25], (1, d_model), jnp.float32) * 0.01,
        },
    }


if __name__ == "__main__":
    B, T, S, D, H, F = 2, 8, 10, 32, 4, 64

    key = jax.random.PRNGKey(0)
    kx, km, kp = jax.random.split(key, 3)
    x = jax.random.normal(kx, (B, T, D), jnp.float32)
    memory = jax.random.normal(km, (B, S, D), jnp.float32)

    # causal target mask (B, T, T); padding-style source mask (B, T, S)
    tgt_mask = jnp.broadcast_to(jnp.tril(jnp.ones((T, T), jnp.float32)), (B, T, T))
    src_lens = jnp.array([S, S - 3], jnp.int32)
    src_mask = (jnp.arange(S)[None, None, :] < src_lens[:, None, None])
    src_mask = jnp.broadcast_to(src_mask, (B, T, S)).astype(jnp.float32)

    params = make_params(kp, D, F)
    ref = ref_decoder_layer(x, memory, src_mask, tgt_mask, params, H)

    # f32 path: exact parity with the reference.
    out_f32 = decoder_layer(x, memory, src_mask, tgt_mask, params, H,
                            compute_dtype=jnp.float32)
    out_f32 = jax.block_until_ready(out_f32)
    assert out_f32.shape == (B, T, D)
    err32 = float(jnp.max(jnp.abs(out_f32 - ref)))
    assert err32 < 1e-4, err32

    # bf16 MXU-operand path (production configuration): loose tolerance.
    out_bf16 = decoder_layer(x, memory, src_mask, tgt_mask, params, H,
                             compute_dtype=jnp.bfloat16)
    out_bf16 = jax.block_until_ready(out_bf16)
    err16 = float(jnp.max(jnp.abs(out_bf16 - ref)))
    assert err16 < 1e-1, err16

    print("KERNEL_OK")
</pallas_src>

<mosaic_0001>
module attributes {stable_mosaic.version = 11 : i64} {
  func.func @kernel(%arg0: i32, %arg1: i32, %arg2: memref<1x8x32xf32, #tpu.memory_space<vmem>>, %arg3: memref<1x8x8xf32, #tpu.memory_space<vmem>>, %arg4: memref<1x32xf32, #tpu.memory_space<vmem>>, %arg5: memref<1x32xf32, #tpu.memory_space<vmem>>, %arg6: memref<32x32xf32, #tpu.memory_space<vmem>>, %arg7: memref<1x32xf32, #tpu.memory_space<vmem>>, %arg8: memref<32x64xf32, #tpu.memory_space<vmem>>, %arg9: memref<1x64xf32, #tpu.memory_space<vmem>>, %arg10: memref<32x32xf32, #tpu.memory_space<vmem>>, %arg11: memref<1x32xf32, #tpu.memory_space<vmem>>, %arg12: memref<1x8x32xf32, #tpu.memory_space<vmem>>, %arg13: memref<8x32xf32, #tpu.memory_space<vmem>>, %arg14: memref<8x64xf32, #tpu.memory_space<vmem>>, %arg15: memref<8x32xf32, #tpu.memory_space<vmem>>) attributes {dimension_semantics = [#tpu.dimension_semantics<parallel>, #tpu.dimension_semantics<arbitrary>], iteration_bounds = array<i64: 2, 1>, scalar_prefetch = 0 : i64, scratch_operands = 3 : i64, tpu.core_type = #tpu.core_type<tc>, window_params = [{transform_indices = @transform_0, window_bounds = array<i64: 1, 8, 32>}, {transform_indices = @transform_1, window_bounds = array<i64: 1, 8, 8>}, {pipeline_mode = #tpu.pipeline_mode<synchronous>, transform_indices = @transform_2, window_bounds = array<i64: 1, 32>}, {pipeline_mode = #tpu.pipeline_mode<synchronous>, transform_indices = @transform_3, window_bounds = array<i64: 1, 32>}, {pipeline_mode = #tpu.pipeline_mode<synchronous>, transform_indices = @transform_4, window_bounds = array<i64: 32, 32>}, {pipeline_mode = #tpu.pipeline_mode<synchronous>, transform_indices = @transform_5, window_bounds = array<i64: 1, 32>}, {pipeline_mode = #tpu.pipeline_mode<synchronous>, transform_indices = @transform_6, window_bounds = array<i64: 32, 64>}, {pipeline_mode = #tpu.pipeline_mode<synchronous>, transform_indices = @transform_7, window_bounds = array<i64: 1, 64>}, {pipeline_mode = #tpu.pipeline_mode<synchronous>, transform_indices = @transform_8, window_bounds = array<i64: 32, 32>}, {pipeline_mode = #tpu.pipeline_mode<synchronous>, transform_indices = @transform_9, window_bounds = array<i64: 1, 32>}, {transform_indices = @transform_10, window_bounds = array<i64: 1, 8, 32>}]} {
    %c0_i32 = arith.constant 0 : i32
    %0 = arith.cmpi eq, %arg1, %c0_i32 : i32
    %1 = arith.extui %0 : i1 to i32
    %c0_i32_0 = arith.constant 0 : i32
    %2 = arith.cmpi ne, %1, %c0_i32_0 : i32
    scf.if %2 {
      %c0_60 = arith.constant 0 : index
      %c0_61 = arith.constant 0 : index
      %c0_62 = arith.constant 0 : index
      %108 = vector.load %arg2[%c0_60, %c0_61, %c0_62] : memref<1x8x32xf32, #tpu.memory_space<vmem>>, vector<1x8x32xf32>
      %109 = vector.shape_cast %108 : vector<1x8x32xf32> to vector<8x32xf32>
      %c0_63 = arith.constant 0 : index
      %c0_64 = arith.constant 0 : index
      %110 = vector.load %arg4[%c0_63, %c0_64] : memref<1x32xf32, #tpu.memory_space<vmem>>, vector<1x32xf32>
      %c0_65 = arith.constant 0 : index
      %c0_66 = arith.constant 0 : index
      %111 = vector.load %arg5[%c0_65, %c0_66] : memref<1x32xf32, #tpu.memory_space<vmem>>, vector<1x32xf32>
      %cst_67 = arith.constant dense<0.000000e+00> : vector<8xf32>
      %112 = vector.multi_reduction <add>, %109, %cst_67 [1] : vector<8x32xf32> to vector<8xf32>
      %113 = vector.shape_cast %112 : vector<8xf32> to vector<8x1xf32>
      %cst_68 = arith.constant 3.200000e+01 : f32
      %114 = vector.broadcast %cst_68 : f32 to vector<8x1xf32>
      %115 = arith.divf %113, %114 : vector<8x1xf32>
      %116 = vector.broadcast %115 : vector<8x1xf32> to vector<8x32xf32>
      %117 = arith.subf %109, %116 : vector<8x32xf32>
      %118 = arith.mulf %117, %117 : vector<8x32xf32>
      %cst_69 = arith.constant dense<0.000000e+00> : vector<8xf32>
      %119 = vector.multi_reduction <add>, %118, %cst_69 [1] : vector<8x32xf32> to vector<8xf32>
      %120 = vector.shape_cast %119 : vector<8xf32> to vector<8x1xf32>
      %cst_70 = arith.constant 3.100000e+01 : f32
      %121 = vector.broadcast %cst_70 : f32 to vector<8x1xf32>
      %122 = arith.divf %120, %121 : vector<8x1xf32>
      %123 = math.sqrt %122 : vector<8x1xf32>
      %124 = vector.broadcast %110 : vector<1x32xf32> to vector<8x32xf32>
      %125 = arith.mulf %124, %117 : vector<8x32xf32>
      %cst_71 = arith.constant 9.99999997E-7 : f32
      %126 = vector.broadcast %cst_71 : f32 to vector<8x1xf32>
      %127 = arith.addf %123, %126 : vector<8x1xf32>
      %128 = vector.broadcast %127 : vector<8x1xf32> to vector<8x32xf32>
      %129 = arith.divf %125, %128 : vector<8x32xf32>
      %130 = vector.broadcast %111 : vector<1x32xf32> to vector<8x32xf32>
      %131 = arith.addf %129, %130 : vector<8x32xf32>
      %c0_72 = arith.constant 0 : index
      %c0_73 = arith.constant 0 : index
      %132 = vector.load %arg13[%c0_72, %c0_73] : memref<8x32xf32, #tpu.memory_space<vmem>>, vector<8x32xf32>
      tpu.vector_store %arg13[%c0_72, %c0_73], %131 {strides = array<i32>} : memref<8x32xf32, #tpu.memory_space<vmem>>, vector<8x32xf32>,
      %c0_74 = arith.constant 0 : index
      %c0_75 = arith.constant 0 : index
      %133 = vector.load %arg13[%c0_74, %c0_75] : memref<8x32xf32, #tpu.memory_space<vmem>>, vector<8x32xf32>
      %c0_76 = arith.constant 0 : index
      %c0_77 = arith.constant 0 : index
      %134 = vector.load %arg8[%c0_76, %c0_77] : memref<32x64xf32, #tpu.memory_space<vmem>>, vector<32x64xf32>
      %cst_78 = arith.constant dense<0.000000e+00> : vector<8x64xf32>
      %135 = tpu.matmul %133, %134, %cst_78 {dimension_numbers = #tpu.dot_dimension_numbers<[1], [0], [0], [1], [0, 0, 1, 1], [], []>} : vector<8x32xf32>, vector<32x64xf32>, vector<8x64xf32> -> vector<8x64xf32>
      %c0_79 = arith.constant 0 : index
      %c0_80 = arith.constant 0 : index
      %136 = vector.load %arg9[%c0_79, %c0_80] : memref<1x64xf32, #tpu.memory_space<vmem>>, vector<1x64xf32>
      %137 = vector.broadcast %136 : vector<1x64xf32> to vector<8x64xf32>
      %138 = arith.addf %135, %137 : vector<8x64xf32>
      %c0_81 = arith.constant 0 : index
      %c0_82 = arith.constant 0 : index
      %139 = vector.load %arg14[%c0_81, %c0_82] : memref<8x64xf32, #tpu.memory_space<vmem>>, vector<8x64xf32>
      tpu.vector_store %arg14[%c0_81, %c0_82], %138 {strides = array<i32>} : memref<8x64xf32, #tpu.memory_space<vmem>>, vector<8x64xf32>,
    } else {
    }
    %c8_i32 = arith.constant 8 : i32
    %3 = arith.muli %arg1, %c8_i32 : i32
    %4 = tpu.assume_multiple %3, 8 : i32
    %c0 = arith.constant 0 : index
    %5 = arith.index_cast %4 : i32 to index
    %c0_1 = arith.constant 0 : index
    %6 = vector.load %arg2[%c0, %5, %c0_1] : memref<1x8x32xf32, #tpu.memory_space<vmem>>, vector<1x8x32xf32>
    %7 = vector.shape_cast %6 : vector<1x8x32xf32> to vector<8x32xf32>
    %8 = arith.index_cast %4 : i32 to index
    %c0_2 = arith.constant 0 : index
    %9 = vector.load %arg13[%8, %c0_2] : memref<8x32xf32, #tpu.memory_space<vmem>>, vector<8x32xf32>
    %c0_3 = arith.constant 0 : index
    %c0_4 = arith.constant 0 : index
    %c0_5 = arith.constant 0 : index
    %10 = vector.load %arg3[%c0_3, %c0_4, %c0_5] : memref<1x8x8xf32, #tpu.memory_space<vmem>>, vector<1x8x8xf32>
    %11 = vector.shape_cast %10 : vector<1x8x8xf32> to vector<8x8xf32>
    %cst = arith.constant 0.000000e+00 : f32
    %12 = vector.broadcast %cst : f32 to vector<8x8xf32>
    %13 = arith.cmpf oeq, %11, %12 : vector<8x8xf32>
    %cst_6 = arith.constant -1.000000e+09 : f32
    %cst_7 = arith.constant 0.000000e+00 : f32
    %14 = vector.broadcast %cst_6 : f32 to vector<8x8xf32>
    %15 = vector.broadcast %cst_7 : f32 to vector<8x8xf32>
    %16 = arith.select %13, %14, %15 : vector<8x8xi1>, vector<8x8xf32>
    %c0_8 = arith.constant 0 : index
    %c0_9 = arith.constant 0 : index
    %17 = vector.load %arg6[%c0_8, %c0_9] : memref<32x32xf32, #tpu.memory_space<vmem>>, vector<32x32xf32>
    %cst_10 = arith.constant dense<0.000000e+00> : vector<8x32xf32>
    %18 = tpu.matmul %9, %17, %cst_10 {dimension_numbers = #tpu.dot_dimension_numbers<[1], [0], [0], [1], [0, 0, 1, 1], [], []>} : vector<8x32xf32>, vector<32x32xf32>, vector<8x32xf32> -> vector<8x32xf32>
    %c0_11 = arith.constant 0 : index
    %c0_12 = arith.constant 0 : index
    %19 = vector.load %arg7[%c0_11, %c0_12] : memref<1x32xf32, #tpu.memory_space<vmem>>, vector<1x32xf32>
    %20 = vector.broadcast %19 : vector<1x32xf32> to vector<8x32xf32>
    %21 = arith.addf %18, %20 : vector<8x32xf32>
    %22 = vector.extract_strided_slice %21 {offsets = [0, 0], sizes = [8, 8], strides = [1, 1]} : vector<8x32xf32> to vector<8x8xf32>
    %c0_13 = arith.constant 0 : index
    %c0_14 = arith.constant 0 : index
    %23 = vector.load %arg14[%c0_13, %c0_14] : memref<8x64xf32, #tpu.memory_space<vmem>>, vector<8x8xf32>
    %c0_15 = arith.constant 0 : index
    %c32 = arith.constant 32 : index
    %24 = vector.load %arg14[%c0_15, %c32] : memref<8x64xf32, #tpu.memory_space<vmem>>, vector<8x8xf32>
    %cst_16 = arith.constant dense<0.000000e+00> : vector<8x8xf32>
    %25 = tpu.matmul %22, %23, %cst_16 {dimension_numbers = #tpu.dot_dimension_numbers<[1], [1], [0], [0], [0, 0, 1, 0], [], []>} : vector<8x8xf32>, vector<8x8xf32>, vector<8x8xf32> -> vector<8x8xf32>
    %cst_17 = arith.constant 0.353553385 : f32
    %26 = vector.broadcast %cst_17 : f32 to vector<8x8xf32>
    %27 = arith.mulf %25, %26 : vector<8x8xf32>
    %28 = arith.addf %27, %16 : vector<8x8xf32>
    %cst_18 = arith.constant dense<0xFF800000> : vector<8xf32>
    %29 = vector.multi_reduction <maximumf>, %28, %cst_18 [1] : vector<8x8xf32> to vector<8xf32>
    %30 = vector.shape_cast %29 : vector<8xf32> to vector<8x1xf32>
    %31 = vector.broadcast %30 : vector<8x1xf32> to vector<8x8xf32>
    %32 = arith.subf %28, %31 : vector<8x8xf32>
    %33 = math.exp %32 : vector<8x8xf32>
    %cst_19 = arith.constant dense<0.000000e+00> : vector<8xf32>
    %34 = vector.multi_reduction <add>, %33, %cst_19 [1] : vector<8x8xf32> to vector<8xf32>
    %35 = vector.shape_cast %34 : vector<8xf32> to vector<8x1xf32>
    %cst_20 = arith.constant dense<0.000000e+00> : vector<8x8xf32>
    %36 = tpu.matmul %33, %24, %cst_20 {dimension_numbers = #tpu.dot_dimension_numbers<[1], [0], [0], [1], [0, 0, 1, 1], [], []>} : vector<8x8xf32>, vector<8x8xf32>, vector<8x8xf32> -> vector<8x8xf32>
    %37 = tpu.reciprocal %35 : vector<8x1xf32> -> vector<8x1xf32>
    %38 = vector.broadcast %37 : vector<8x1xf32> to vector<8x8xf32>
    %39 = arith.mulf %36, %38 : vector<8x8xf32>
    %c0_21 = arith.constant 0 : index
    %c0_22 = arith.constant 0 : index
    %40 = vector.load %arg15[%c0_21, %c0_22] : memref<8x32xf32, #tpu.memory_space<vmem>>, vector<8x8xf32>
    tpu.vector_store %arg15[%c0_21, %c0_22], %39 {strides = array<i32>} : memref<8x32xf32, #tpu.memory_space<vmem>>, vector<8x8xf32>,
    %41 = vector.extract_strided_slice %21 {offsets = [0, 8], sizes = [8, 8], strides = [1, 1]} : vector<8x32xf32> to vector<8x8xf32>
    %c0_23 = arith.constant 0 : index
    %c8 = arith.constant 8 : index
    %42 = vector.load %arg14[%c0_23, %c8] : memref<8x64xf32, #tpu.memory_space<vmem>>, vector<8x8xf32>
    %c0_24 = arith.constant 0 : index
    %c40 = arith.constant 40 : index
    %43 = vector.load %arg14[%c0_24, %c40] : memref<8x64xf32, #tpu.memory_space<vmem>>, vector<8x8xf32>
    %cst_25 = arith.constant dense<0.000000e+00> : vector<8x8xf32>
    %44 = tpu.matmul %41, %42, %cst_25 {dimension_numbers = #tpu.dot_dimension_numbers<[1], [1], [0], [0], [0, 0, 1, 0], [], []>} : vector<8x8xf32>, vector<8x8xf32>, vector<8x8xf32> -> vector<8x8xf32>
    %cst_26 = arith.constant 0.353553385 : f32
    %45 = vector.broadcast %cst_26 : f32 to vector<8x8xf32>
    %46 = arith.mulf %44, %45 : vector<8x8xf32>
    %47 = arith.addf %46, %16 : vector<8x8xf32>
    %cst_27 = arith.constant dense<0xFF800000> : vector<8xf32>
    %48 = vector.multi_reduction <maximumf>, %47, %cst_27 [1] : vector<8x8xf32> to vector<8xf32>
    %49 = vector.shape_cast %48 : vector<8xf32> to vector<8x1xf32>
    %50 = vector.broadcast %49 : vector<8x1xf32> to vector<8x8xf32>
    %51 = arith.subf %47, %50 : vector<8x8xf32>
    %52 = math.exp %51 : vector<8x8xf32>
    %cst_28 = arith.constant dense<0.000000e+00> : vector<8xf32>
    %53 = vector.multi_reduction <add>, %52, %cst_28 [1] : vector<8x8xf32> to vector<8xf32>
    %54 = vector.shape_cast %53 : vector<8xf32> to vector<8x1xf32>
    %cst_29 = arith.constant dense<0.000000e+00> : vector<8x8xf32>
    %55 = tpu.matmul %52, %43, %cst_29 {dimension_numbers = #tpu.dot_dimension_numbers<[1], [0], [0], [1], [0, 0, 1, 1], [], []>} : vector<8x8xf32>, vector<8x8xf32>, vector<8x8xf32> -> vector<8x8xf32>
    %56 = tpu.reciprocal %54 : vector<8x1xf32> -> vector<8x1xf32>
    %57 = vector.broadcast %56 : vector<8x1xf32> to vector<8x8xf32>
    %58 = arith.mulf %55, %57 : vector<8x8xf32>
    %c0_30 = arith.constant 0 : index
    %c8_31 = arith.constant 8 : index
    %59 = vector.load %arg15[%c0_30, %c8_31] : memref<8x32xf32, #tpu.memory_space<vmem>>, vector<8x8xf32>
    tpu.vector_store %arg15[%c0_30, %c8_31], %58 {strides = array<i32>} : memref<8x32xf32, #tpu.memory_space<vmem>>, vector<8x8xf32>,
    %60 = vector.extract_strided_slice %21 {offsets = [0, 16], sizes = [8, 8], strides = [1, 1]} : vector<8x32xf32> to vector<8x8xf32>
    %c0_32 = arith.constant 0 : index
    %c16 = arith.constant 16 : index
    %61 = vector.load %arg14[%c0_32, %c16] : memref<8x64xf32, #tpu.memory_space<vmem>>, vector<8x8xf32>
    %c0_33 = arith.constant 0 : index
    %c48 = arith.constant 48 : index
    %62 = vector.load %arg14[%c0_33, %c48] : memref<8x64xf32, #tpu.memory_space<vmem>>, vector<8x8xf32>
    %cst_34 = arith.constant dense<0.000000e+00> : vector<8x8xf32>
    %63 = tpu.matmul %60, %61, %cst_34 {dimension_numbers = #tpu.dot_dimension_numbers<[1], [1], [0], [0], [0, 0, 1, 0], [], []>} : vector<8x8xf32>, vector<8x8xf32>, vector<8x8xf32> -> vector<8x8xf32>
    %cst_35 = arith.constant 0.353553385 : f32
    %64 = vector.broadcast %cst_35 : f32 to vector<8x8xf32>
    %65 = arith.mulf %63, %64 : vector<8x8xf32>
    %66 = arith.addf %65, %16 : vector<8x8xf32>
    %cst_36 = arith.constant dense<0xFF800000> : vector<8xf32>
    %67 = vector.multi_reduction <maximumf>, %66, %cst_36 [1] : vector<8x8xf32> to vector<8xf32>
    %68 = vector.shape_cast %67 : vector<8xf32> to vector<8x1xf32>
    %69 = vector.broadcast %68 : vector<8x1xf32> to vector<8x8xf32>
    %70 = arith.subf %66, %69 : vector<8x8xf32>
    %71 = math.exp %70 : vector<8x8xf32>
    %cst_37 = arith.constant dense<0.000000e+00> : vector<8xf32>
    %72 = vector.multi_reduction <add>, %71, %cst_37 [1] : vector<8x8xf32> to vector<8xf32>
    %73 = vector.shape_cast %72 : vector<8xf32> to vector<8x1xf32>
    %cst_38 = arith.constant dense<0.000000e+00> : vector<8x8xf32>
    %74 = tpu.matmul %71, %62, %cst_38 {dimension_numbers = #tpu.dot_dimension_numbers<[1], [0], [0], [1], [0, 0, 1, 1], [], []>} : vector<8x8xf32>, vector<8x8xf32>, vector<8x8xf32> -> vector<8x8xf32>
    %75 = tpu.reciprocal %73 : vector<8x1xf32> -> vector<8x1xf32>
    %76 = vector.broadcast %75 : vector<8x1xf32> to vector<8x8xf32>
    %77 = arith.mulf %74, %76 : vector<8x8xf32>
    %c0_39 = arith.constant 0 : index
    %c16_40 = arith.constant 16 : index
    %78 = vector.load %arg15[%c0_39, %c16_40] : memref<8x32xf32, #tpu.memory_space<vmem>>, vector<8x8xf32>
    tpu.vector_store %arg15[%c0_39, %c16_40], %77 {strides = array<i32>} : memref<8x32xf32, #tpu.memory_space<vmem>>, vector<8x8xf32>,
    %79 = vector.extract_strided_slice %21 {offsets = [0, 24], sizes = [8, 8], strides = [1, 1]} : vector<8x32xf32> to vector<8x8xf32>
    %c0_41 = arith.constant 0 : index
    %c24 = arith.constant 24 : index
    %80 = vector.load %arg14[%c0_41, %c24] : memref<8x64xf32, #tpu.memory_space<vmem>>, vector<8x8xf32>
    %c0_42 = arith.constant 0 : index
    %c56 = arith.constant 56 : index
    %81 = vector.load %arg14[%c0_42, %c56] : memref<8x64xf32, #tpu.memory_space<vmem>>, vector<8x8xf32>
    %cst_43 = arith.constant dense<0.000000e+00> : vector<8x8xf32>
    %82 = tpu.matmul %79, %80, %cst_43 {dimension_numbers = #tpu.dot_dimension_numbers<[1], [1], [0], [0], [0, 0, 1, 0], [], []>} : vector<8x8xf32>, vector<8x8xf32>, vector<8x8xf32> -> vector<8x8xf32>
    %cst_44 = arith.constant 0.353553385 : f32
    %83 = vector.broadcast %cst_44 : f32 to vector<8x8xf32>
    %84 = arith.mulf %82, %83 : vector<8x8xf32>
    %85 = arith.addf %84, %16 : vector<8x8xf32>
    %cst_45 = arith.constant dense<0xFF800000> : vector<8xf32>
    %86 = vector.multi_reduction <maximumf>, %85, %cst_45 [1] : vector<8x8xf32> to vector<8xf32>
    %87 = vector.shape_cast %86 : vector<8xf32> to vector<8x1xf32>
    %88 = vector.broadcast %87 : vector<8x1xf32> to vector<8x8xf32>
    %89 = arith.subf %85, %88 : vector<8x8xf32>
    %90 = math.exp %89 : vector<8x8xf32>
    %cst_46 = arith.constant dense<0.000000e+00> : vector<8xf32>
    %91 = vector.multi_reduction <add>, %90, %cst_46 [1] : vector<8x8xf32> to vector<8xf32>
    %92 = vector.shape_cast %91 : vector<8xf32> to vector<8x1xf32>
    %cst_47 = arith.constant dense<0.000000e+00> : vector<8x8xf32>
    %93 = tpu.matmul %90, %81, %cst_47 {dimension_numbers = #tpu.dot_dimension_numbers<[1], [0], [0], [1], [0, 0, 1, 1], [], []>} : vector<8x8xf32>, vector<8x8xf32>, vector<8x8xf32> -> vector<8x8xf32>
    %94 = tpu.reciprocal %92 : vector<8x1xf32> -> vector<8x1xf32>
    %95 = vector.broadcast %94 : vector<8x1xf32> to vector<8x8xf32>
    %96 = arith.mulf %93, %95 : vector<8x8xf32>
    %c0_48 = arith.constant 0 : index
    %c24_49 = arith.constant 24 : index
    %97 = vector.load %arg15[%c0_48, %c24_49] : memref<8x32xf32, #tpu.memory_space<vmem>>, vector<8x8xf32>
    tpu.vector_store %arg15[%c0_48, %c24_49], %96 {strides = array<i32>} : memref<8x32xf32, #tpu.memory_space<vmem>>, vector<8x8xf32>,
    %c0_50 = arith.constant 0 : index
    %c0_51 = arith.constant 0 : index
    %98 = vector.load %arg15[%c0_50, %c0_51] : memref<8x32xf32, #tpu.memory_space<vmem>>, vector<8x32xf32>
    %c0_52 = arith.constant 0 : index
    %c0_53 = arith.constant 0 : index
    %99 = vector.load %arg10[%c0_52, %c0_53] : memref<32x32xf32, #tpu.memory_space<vmem>>, vector<32x32xf32>
    %cst_54 = arith.constant dense<0.000000e+00> : vector<8x32xf32>
    %100 = tpu.matmul %98, %99, %cst_54 {dimension_numbers = #tpu.dot_dimension_numbers<[1], [0], [0], [1], [0, 0, 1, 1], [], []>} : vector<8x32xf32>, vector<32x32xf32>, vector<8x32xf32> -> vector<8x32xf32>
    %c0_55 = arith.constant 0 : index
    %c0_56 = arith.constant 0 : index
    %101 = vector.load %arg11[%c0_55, %c0_56] : memref<1x32xf32, #tpu.memory_space<vmem>>, vector<1x32xf32>
    %102 = vector.broadcast %101 : vector<1x32xf32> to vector<8x32xf32>
    %103 = arith.addf %100, %102 : vector<8x32xf32>
    %104 = arith.addf %7, %103 : vector<8x32xf32>
    %c0_57 = arith.constant 0 : index
    %c0_58 = arith.constant 0 : index
    %c0_59 = arith.constant 0 : index
    %105 = vector.load %arg12[%c0_57, %c0_58, %c0_59] : memref<1x8x32xf32, #tpu.memory_space<vmem>>, vector<1x8x32xf32>
    %106 = vector.shape_cast %105 : vector<1x8x32xf32> to vector<8x32xf32>
    %107 = vector.shape_cast %104 : vector<8x32xf32> to vector<1x8x32xf32>
    tpu.vector_store %arg12[%c0_57, %c0_58, %c0_59], %107 {strides = array<i32>} : memref<1x8x32xf32, #tpu.memory_space<vmem>>, vector<1x8x32xf32>,
    return
  }
  func.func @transform_0(%arg0: i32, %arg1: i32) -> (i32, i32, i32) {
    %c0_i32 = arith.constant 0 : i32
    %c0_i32_0 = arith.constant 0 : i32
    %c0_i32_1 = arith.constant 0 : i32
    return %arg0, %c0_i32, %c0_i32_0 : i32, i32, i32
  }
  func.func @transform_1(%arg0: i32, %arg1: i32) -> (i32, i32, i32) {
    %c0_i32 = arith.constant 0 : i32
    %c0_i32_0 = arith.constant 0 : i32
    return %arg0, %arg1, %c0_i32 : i32, i32, i32
  }
  func.func @transform_2(%arg0: i32, %arg1: i32) -> (i32, i32) {
    %c0_i32 = arith.constant 0 : i32
    %c0_i32_0 = arith.constant 0 : i32
    %c0_i32_1 = arith.constant 0 : i32
    return %c0_i32, %c0_i32_0 : i32, i32
  }
  func.func @transform_3(%arg0: i32, %arg1: i32) -> (i32, i32) {
    %c0_i32 = arith.constant 0 : i32
    %c0_i32_0 = arith.constant 0 : i32
    %c0_i32_1 = arith.constant 0 : i32
    return %c0_i32, %c0_i32_0 : i32, i32
  }
  func.func @transform_4(%arg0: i32, %arg1: i32) -> (i32, i32) {
    %c0_i32 = arith.constant 0 : i32
    %c0_i32_0 = arith.constant 0 : i32
    %c0_i32_1 = arith.constant 0 : i32
    return %c0_i32, %c0_i32_0 : i32, i32
  }
  func.func @transform_5(%arg0: i32, %arg1: i32) -> (i32, i32) {
    %c0_i32 = arith.constant 0 : i32
    %c0_i32_0 = arith.constant 0 : i32
    %c0_i32_1 = arith.constant 0 : i32
    return %c0_i32, %c0_i32_0 : i32, i32
  }
  func.func @transform_6(%arg0: i32, %arg1: i32) -> (i32, i32) {
    %c0_i32 = arith.constant 0 : i32
    %c0_i32_0 = arith.constant 0 : i32
    %c0_i32_1 = arith.constant 0 : i32
    return %c0_i32, %c0_i32_0 : i32, i32
  }
  func.func @transform_7(%arg0: i32, %arg1: i32) -> (i32, i32) {
    %c0_i32 = arith.constant 0 : i32
    %c0_i32_0 = arith.constant 0 : i32
    %c0_i32_1 = arith.constant 0 : i32
    return %c0_i32, %c0_i32_0 : i32, i32
  }
  func.func @transform_8(%arg0: i32, %arg1: i32) -> (i32, i32) {
    %c0_i32 = arith.constant 0 : i32
    %c0_i32_0 = arith.constant 0 : i32
    %c0_i32_1 = arith.constant 0 : i32
    return %c0_i32, %c0_i32_0 : i32, i32
  }
  func.func @transform_9(%arg0: i32, %arg1: i32) -> (i32, i32) {
    %c0_i32 = arith.constant 0 : i32
    %c0_i32_0 = arith.constant 0 : i32
    %c0_i32_1 = arith.constant 0 : i32
    return %c0_i32, %c0_i32_0 : i32, i32
  }
  func.func @transform_10(%arg0: i32, %arg1: i32) -> (i32, i32, i32) {
    %c0_i32 = arith.constant 0 : i32
    %c0_i32_0 = arith.constant 0 : i32
    return %arg0, %arg1, %c0_i32 : i32, i32, i32
  }
}

</mosaic_0001>

<bundles_post_ra>
// kernel: tpu_custom_call.1
= control target key start
LH: loop header
LB: loop body
LE: loop exit
PB: predicated region body
PF: predicated region fallthrough
CT: control target
= control target key end

     0   :  { %s2658_s0 = inlined_call_operand.hbm [shape: f32[2,8,32], index: 0, kind: input, shape index: {}]   ;;  %s2659_s1 = inlined_call_operand.hbm [shape: f32[2,8,8], index: 1, kind: input, shape index: {}]   ;;  %s2660_s2 = inlined_call_operand.vmem [shape: f32[1,32], index: 2, kind: input, shape index: {}]   ;;  %s2661_s3 = inlined_call_operand.vmem [shape: f32[1,32], index: 3, kind: input, shape index: {}]   ;;  %s2662_s4 = inlined_call_operand.hbm [shape: f32[32,32], index: 4, kind: input, shape index: {}]   ;;  %s2663_s5 = inlined_call_operand.vmem [shape: f32[1,32], index: 5, kind: input, shape index: {}]   ;;  %s2664_s6 = inlined_call_operand.hbm [shape: f32[32,64], index: 6, kind: input, shape index: {}]   ;;  %s2665_s7 = inlined_call_operand.vmem [shape: f32[1,64], index: 7, kind: input, shape index: {}]   ;;  %s2666_s8 = inlined_call_operand.hbm [shape: f32[32,32], index: 8, kind: input, shape index: {}]   ;;  %s2667_s9 = inlined_call_operand.vmem [shape: f32[1,32], index: 9, kind: input, shape index: {}]   ;;  %s2668_s10 = inlined_call_operand.hbm [shape: f32[2,8,32], index: 10, kind: output, shape index: {}]  }
   0x1   :  { %2676 = sst [smem:[#allocation23_spill]] %s2662_s4 }
   0x2   :  { %2677 = sst [smem:[#allocation24_spill]] %s2663_s5 }
   0x3   :  { %2678 = sst [smem:[#allocation25_spill]] %s2664_s6 }
   0x4   :  { %2679 = sst [smem:[#allocation26_spill]] %s2666_s8 }
   0x5   :  { %2680 = sst [smem:[#allocation27_spill]] %s2667_s9 }
   0x6   :  { %2681 = sst [smem:[#allocation28_spill]] %s2668_s10 }
   0x7   :  { %15 = vsyncpa [#allocation6], 0 }
   0x8   :  { %17 = vsyncpa [#allocation6 + $0x1], 0 }
   0x9   :  { %18 = vsyncpa [#allocation9], 0 }
   0xa   :  { %20 = vsyncpa [#allocation9 + $0x1], 0 }
   0xb   :  { %21 = vsyncpa [#allocation12], 0 }
   0xc   :  { %22 = vsyncpa [#allocation7], 0 }
   0xd   :  { %24 = vsyncpa [#allocation7 + $0x1], 0  ;;  %s2240_s13 = smov 0   ;;  %s2242_s14 = smov 0  }
   0xe   :  { %s2244_s15 = smov 0   ;;  %s2246_s16 = smov 0  }
   0xf   :  { %s2248_s17 = smov 0   ;;  %s2250_s18 = smov 0  }
  0x10 LB: > { %2682 = sst [smem:[#allocation20_spill]] %s2142_s13  ;;  %s2271_s19 = sadd.s32 4294967295, %s2162_s18   ;;  %s2162_s18 = sphi %s2250_s18, %s30_s18   ;;  %s2158_s17 = sphi %s2248_s17, %s2716_s17   ;;  %s2154_s16 = sphi %s2246_s16, %s2715_s16   ;;  %s2150_s15 = sphi %s2244_s15, %s2714_s15   ;;  %s2146_s14 = sphi %s2242_s14, %s2713_s14   ;;  %s2142_s13 = sphi %s2240_s13, %s2712_s13  }
  0x11   : > { %2683 = sst [smem:[#allocation21_spill]] %s2154_s16  ;;  %s1628_s20 = sadd.s32 4294967294, %s2162_s18  }
  0x12   : > { %p62_p0 = scmp.ne.s32.totalorder %s2146_s14, %s2142_s13  ;;  %p2671_p1 = scmp.eq.s32.totalorder %s2271_s19, 0 }
  0x13   : > { %p290_p3 = scmp.eq.s32.totalorder %s1628_s20, 1  ;;  %p1629_p5 = scmp.ge.s32.totalorder %s2162_s18, 1 }
  0x14   : > { %p2280_p4 = por %p2671_p1, %p62_p0  ;;  %p297_p7 = scmp.lt.s32.totalorder %s2162_s18, 3 }
  0x15   : > { %p2285_p6 = por %p290_p3, %p62_p0  ;;  %s2164_s24 = smov [#allocation10]  }
  0x16   : > { %s2684_s21 = scalar_select %p2280_p4, 1, 0 }
  0x17   : > { %s2685_s22 = scalar_select %p2285_p6, 1, 0 }
  0x18   : > { %p2290_p8 = pnand %p1629_p5, %p297_p7  ;;  %s315_s25 = sshll.u32 %s2164_s24, 4  ;;  %s2294_s25 = int_to_ptr.vmem [resolvable:$true] %s315_s25 }
  0x19   : > { %2686 = sst [smem:[#allocation22_spill]] %s2685_s22  ;;  %s2165_s27 = smov [#allocation11]  }
  0x1a   : > { %s2687_s23 = scalar_select %p2290_p8, 1, 0 }
  0x1b   : > { %p1809_p9 = pneg %p2290_p8  ;;  %s331_s28 = sshll.u32 %s2165_s27, 4  ;;  %s2305_s28 = int_to_ptr.vmem [resolvable:$true] %s331_s28 }
  0x1c   : > { %s2166_s29 = smov [#allocation13]   ;;  %s2689_s4 = sld [smem:[#allocation23_spill]] }
  0x1d   : > { %p2301_p11 = pnand %p1809_p9, %p2671_p1  ;;  %s2307_s30 = sshll.u32 %s2166_s29, 4  ;;  %s348_s30 = int_to_ptr.vmem [resolvable:$true] %s2307_s30 }
  0x1f   : > { %p2317_p13 = pneg %p2301_p11 }
  0x22   : > { %s1924_s20 = scalar_lea.hbm %s2689_s4, 512 }
  0x23   : > { %p1925_p12 = scmp.ne.s32.totalorder %s2689_s4, %s1924_s20  ;;  %p1931_p5 = scmp.lt.u32.totalorder %s1924_s20, %s2689_s4 }
  0x25   : > { %p1927_p0 = pnand %p2317_p13, %p1925_p12 }
  0x27   : > { %p1928_p3 = pneg %p1927_p0 }
  0x29   : > { %p1933_p7 = pnand %p1931_p5, %p1928_p3 }
  0x2b   : > { %1936 = shalt.err (!%p1933_p7)
}
  0x2c   : > { %s1937_s22 = scalar_lea.vmem %s2294_s25, 512  ;;  %p1945_p2 = scmp.lt.s32.totalorder %s2294_s25, %s2294_s25 }
  0x2d   : > { %p1938_p9 = scmp.ne.s32.totalorder %s2294_s25, %s1937_s22  ;;  %p1946_p6 = scmp.lt.s32.totalorder %s1937_s22, %s1937_s22 }
  0x2f   : > { %p1940_p10 = pnand %p1938_p9, %p2317_p13  ;;  %p1947_p12 = por %p1946_p6, %p1945_p2 }
  0x31   : > { %p1941_p1 = pneg %p1940_p10 }
  0x33   : > { %p1948_p0 = pnand %p1947_p12, %p1941_p1 }
  0x35   : > { %1951 = shalt.err (!%p1948_p0)
}
  0x36   : > { %s2167_s11 = smov 128   ;;  %s2168_s12 = smov 8  }
  0x37   : > { %1812 = dma.hbm_to_vmem [thread:$0]  (!%p2301_p11), %s2689_s4, 512, %s2294_s25, [#allocation9], %s2167_s11, %s2167_s11, %s2168_s12  }
  0x38   : > { %s2691_s6 = sld [smem:[#allocation25_spill]] }
  0x3e   : > { %s1952_s22 = scalar_lea.hbm %s2691_s6, 512 }
  0x3f   : > { %p1953_p1 = scmp.ne.s32.totalorder %s2691_s6, %s1952_s22  ;;  %p1959_p10 = scmp.lt.u32.totalorder %s1952_s22, %s2691_s6 }
  0x41   : > { %p1955_p2 = pnand %p1953_p1, %p2317_p13 }
  0x43   : > { %p1956_p6 = pneg %p1955_p2 }
  0x45   : > { %p1961_p3 = pnand %p1959_p10, %p1956_p6 }
  0x47   : > { %1964 = shalt.err (!%p1961_p3)
}
  0x48   : > { %s1965_s25 = scalar_lea.vmem %s2305_s28, 512  ;;  %p1973_p12 = scmp.lt.s32.totalorder %s2305_s28, %s2305_s28 }
  0x49   : > { %p1966_p5 = scmp.ne.s32.totalorder %s2305_s28, %s1965_s25  ;;  %p1974_p0 = scmp.lt.s32.totalorder %s1965_s25, %s1965_s25 }
  0x4b   : > { %p1968_p7 = pnand %p1966_p5, %p2317_p13  ;;  %p1975_p1 = por %p1974_p0, %p1973_p12 }
  0x4d   : > { %p1969_p9 = pneg %p1968_p7 }
  0x4f   : > { %p1976_p2 = pnand %p1975_p1, %p1969_p9 }
  0x51   : > { %1979 = shalt.err (!%p1976_p2)
}
  0x52   : > { %1815 = dma.hbm_to_vmem [thread:$0]  (!%p2301_p11), %s2691_s6, 512, %s2305_s28, [#allocation12], %s2167_s11, %s2167_s11, %s2168_s12  }
  0x53   : > { %s2692_s8 = sld [smem:[#allocation26_spill]] }
  0x59   : > { %s1980_s20 = scalar_lea.hbm %s2692_s8, 512 }
  0x5a   : > { %p1981_p6 = scmp.ne.s32.totalorder %s2692_s8, %s1980_s20  ;;  %p1987_p5 = scmp.lt.u32.totalorder %s1980_s20, %s2692_s8 }
  0x5c   : > { %p1983_p10 = pnand %p1981_p6, %p2317_p13 }
  0x5e   : > { %p1984_p3 = pneg %p1983_p10 }
  0x60   : > { %p1989_p7 = pnand %p1987_p5, %p1984_p3 }
  0x62   : > { %1992 = shalt.err (!%p1989_p7)
}
  0x63   : > { %s1993_s25 = scalar_lea.vmem %s348_s30, 512  ;;  %p2001_p1 = scmp.lt.s32.totalorder %s348_s30, %s348_s30 }
  0x64   : > { %p1994_p9 = scmp.ne.s32.totalorder %s348_s30, %s1993_s25  ;;  %p2002_p2 = scmp.lt.s32.totalorder %s1993_s25, %s1993_s25 }
  0x66   : > { %p1996_p12 = pnand %p1994_p9, %p2317_p13  ;;  %p2003_p4 = por %p2002_p2, %p2001_p1 }
  0x68   : > { %p1997_p0 = pneg %p1996_p12 }
  0x6a   : > { %p2004_p8 = pnand %p2003_p4, %p1997_p0 }
  0x6c   : > { %2007 = shalt.err (!%p2004_p8)
}
  0x6d   : > { %1818 = dma.hbm_to_vmem [thread:$0]  (!%p2301_p11), %s2692_s8, 512, %s348_s30, [#allocation12], %s2167_s11, %s2167_s11, %s2168_s12  }
  0x6e   : > { %s49_s13 = sadd.s32 1, %s2150_s15  ;;  %s42_s26 = sadd.s32 1, %s2158_s17 }
  0x6f   : > { %p56_p4 = scmp.ne.s32.totalorder %s2150_s15, %s2146_s14  ;;  %p44_p8 = scmp.ge.s32.totalorder %s42_s26, 2 }
  0x70   : > { %p57_p13 = scmp.eq.s32.totalorder %s2162_s18, 0  ;;  %p2693_p6 = scmp.eq.s32.totalorder %s2271_s19, 1 }
  0x71   : > { %p1833_p3 = scmp.lt.s32.totalorder %s2162_s18, 2  ;;  %s2718_s26 = smov (%p44_p8, %s42_s26), 0 }
  0x72   : > { %p2396_p10 = por %p2693_p6, %p56_p4  ;;  %p58_p5 = por %p57_p13, %p56_p4 }
  0x73   : > { %s364_s10 = sand.u32 1, %s2150_s15   ;;  %s46_s16 = ssub.s32 %s2158_s17, %s2718_s26 }
  0x74   : > { %s2694_s9 = scalar_select %p2396_p10, 1, 0 }
  0x75   : > { %p47_p11 = scmp.eq.s32.totalorder %s46_s16, 0  ;;  %s2406_s30 = sshll.u32 %s364_s10, 3 }
  0x76   : > { %s1635_s11 = sshll.u32 %s2158_s17, 7  ;;  %s368_s29 = scalar_lea.vmem [#allocation5], %s2406_s30 }
  0x77   : > { %s2410_s12 = scalar_select %p47_p11, %s2150_s15, %s49_s13  }
  0x78   : > { %s2415_s27 = scalar_lea.hbm %s2658_s0, %s1635_s11  ;;  %s375_s22 = sshll.u32 %s368_s29, 4  ;;  %s2418_s22 = int_to_ptr.vmem [resolvable:$true] %s375_s22 }
  0x79   : > { %p2422_p7 = pnand %p1833_p3, %p58_p5  ;;  %s2429_s13 = scalar_lea.hbm %s2659_s1, %s1635_s11 }
  0x7a   : > { %s382_s16 = sand.u32 1, %s2162_s18   ;;  %s365_s20 = scalar_lea.sflag [#allocation6], %s364_s10 }
  0x7b   : > { %s2008_s24 = scalar_lea.hbm %s2415_s27, 128  ;;  %p2010_p12 = pneg %p2422_p7 }
  0x7c   : > { %p2009_p9 = scmp.ne.s32.totalorder %s2415_s27, %s2008_s24  ;;  %s2013_s6 = scalar_lea.hbm %s2658_s0, 256 }
  0x7d   : > { %p2014_p2 = scmp.lt.u32.totalorder %s2415_s27, %s2658_s0  ;;  %p2015_p4 = scmp.lt.u32.totalorder %s2013_s6, %s2008_s24 }
  0x7e   : > { %p2011_p0 = pnand %p2010_p12, %p2009_p9  ;;  %p2017_p13 = scmp.lt.u32.totalorder %s2008_s24, %s2415_s27 }
  0x7f   : > { %p2016_p8 = por %p2015_p4, %p2014_p2 }
  0x80   : > { %p2012_p1 = pneg %p2011_p0 }
  0x81   : > { %p2018_p6 = por %p2017_p13, %p2016_p8 }
  0x83   : > { %p2019_p3 = pnand %p2018_p6, %p2012_p1 }
  0x85   : > { %2022 = shalt.err (!%p2019_p3)
}
  0x86   : > { %s2023_s10 = scalar_lea.vmem %s2418_s22, 128  ;;  %s2169_s4 = smov [#allocation5]  }
  0x87   : > { %p2024_p5 = scmp.ne.s32.totalorder %s2418_s22, %s2023_s10  ;;  %s2028_s11 = sshll.u32 %s2169_s4, 4  ;;  %s2029_s11 = int_to_ptr.vmem [resolvable:$false] %s2028_s11 }
  0x88   : > { %s2030_s8 = scalar_lea.vmem %s2029_s11, 256  ;;  %p2031_p0 = scmp.lt.s32.totalorder %s2418_s22, %s2029_s11 }
  0x89   : > { %p2026_p11 = pnand %p2024_p5, %p2010_p12  ;;  %p2032_p2 = scmp.lt.s32.totalorder %s2030_s8, %s2023_s10 }
  0x8b   : > { %p2027_p9 = pneg %p2026_p11  ;;  %p2033_p4 = por %p2032_p2, %p2031_p0 }
  0x8d   : > { %p2034_p8 = pnand %p2033_p4, %p2027_p9 }
  0x8f   : > { %2037 = shalt.err (!%p2034_p8)
}
  0x90   : > { %1822 = dma.hbm_to_vmem [thread:$0]  (!%p2422_p7), %s2415_s27, 128, %s2418_s22, %s365_s20  }
  0x91   : > { %s386_s6 = scalar_lea.vmem [#allocation8], %s2406_s30  ;;  %s383_s24 = scalar_lea.sflag [#allocation9], %s382_s16 }
  0x92   : > { %s394_s5 = sshll.u32 %s386_s6, 4  ;;  %s2038_s29 = scalar_lea.hbm %s2429_s13, 128  ;;  %s395_s5 = int_to_ptr.vmem [resolvable:$true] %s394_s5 }
  0x93   : > { %p2039_p1 = scmp.ne.s32.totalorder %s2429_s13, %s2038_s29  ;;  %s2043_s4 = scalar_lea.hbm %s2659_s1, 256 }
  0x94   : > { %p2044_p3 = scmp.lt.u32.totalorder %s2429_s13, %s2659_s1  ;;  %p2045_p5 = scmp.lt.u32.totalorder %s2043_s4, %s2038_s29 }
  0x95   : > { %p2041_p13 = pnand %p2039_p1, %p2010_p12  ;;  %p2047_p9 = scmp.lt.u32.totalorder %s2038_s29, %s2429_s13 }
  0x96   : > { %p2046_p11 = por %p2045_p5, %p2044_p3 }
  0x97   : > { %p2042_p6 = pneg %p2041_p13 }
  0x98   : > { %p2048_p0 = por %p2047_p9, %p2046_p11 }
  0x9a   : > { %p2049_p2 = pnand %p2048_p0, %p2042_p6 }
  0x9c   : > { %2052 = shalt.err (!%p2049_p2)
}
  0x9d   : > { %s2053_s30 = scalar_lea.vmem %s395_s5, 128  ;;  %s2170_s27 = smov [#allocation8]  }
  0x9e   : > { %p2054_p4 = scmp.ne.s32.totalorder %s395_s5, %s2053_s30  ;;  %s2058_s22 = sshll.u32 %s2170_s27, 4  ;;  %s2059_s22 = int_to_ptr.vmem [resolvable:$false] %s2058_s22 }
  0x9f   : > { %s2060_s16 = scalar_lea.vmem %s2059_s22, 256  ;;  %p2061_p13 = scmp.lt.s32.totalorder %s395_s5, %s2059_s22 }
  0xa0   : > { %p2056_p8 = pnand %p2054_p4, %p2010_p12  ;;  %p2062_p10 = scmp.lt.s32.totalorder %s2060_s16, %s2053_s30 }
  0xa2   : > { %p2057_p1 = pneg %p2056_p8  ;;  %p2063_p3 = por %p2062_p10, %p2061_p13 }
  0xa4   : > { %p2064_p5 = pnand %p2063_p3, %p2057_p1 }
  0xa6   : > { %2067 = shalt.err (!%p2064_p5)
}
  0xa7   : > { %1825 = dma.hbm_to_vmem [thread:$0]  (!%p2422_p7), %s2429_s13, 128, %s395_s5, %s383_s24  }
  0xa8   : > { %p2696_p6 = scmp.ne.s32.totalorder %s2687_s23, 0 }
  0xa9   : > { %s2482_s20 = sand.u32 (!%p2696_p6), 1, %s2146_s14   ;;  %p2697_p10 = scmp.ne.s32.totalorder (!%p2696_p6), %s2684_s21, 0 }
  0xaa   : > { %403 = sbr.rel (%p2696_p6) target bundleno = 1812 (0x714), region = 60  ;;  %s2485_s6 = sshll.u32 (!%p2696_p6), %s2482_s20, 3 }
  0xab   : > { %s406_s29 = scalar_lea.sflag (!%p2696_p6), [#allocation6], %s2482_s20  ;;  %s409_s28 = scalar_lea.vmem (!%p2696_p6), [#allocation5], %s2485_s6 }
  0xb1   : > { %2121 = dma.done.wait (%p2697_p10), %s406_s29, 128  }
  0xb2   : > { %2123 = vsyncadd (%p2697_p10), %s406_s29, 4294967168  ;;  %s414_s23 = sand.u32 1, %s2271_s19   ;;  %s418_s13 = scalar_lea.vmem [#allocation8], %s2485_s6 }
  0xb3   : > { %s415_s25 = scalar_lea.sflag [#allocation9], %s414_s23 }
  0xb4   : > { %2125 = dma.done.wait (%p2697_p10), %s415_s25, 128  }
  0xb5   : > { %2127 = vsyncadd (%p2697_p10), %s415_s25, 4294967168  ;;  %p2698_p7 = scmp.eq.s32.totalorder %s2271_s19, 0 }
  0xb7   : > { %2129 = dma.done.wait (%p2698_p7), [#allocation9], 512   ;;  %p2699_p12 = pmov %p2698_p7 }
  0xb8   : > { %p2700_p11 = pmov %p2698_p7 }
  0xb9   : > { %2131 = vsyncadd (%p2699_p12), [#allocation9], 4294966784 }
  0xba   : > { %2133 = dma.done.wait (%p2700_p11), [#allocation12], 1024   ;;  %p2701_p9 = pmov %p2698_p7 }
  0xbb   : > { %vm479_vm0 = vcmask 261120   ;;  %v2507_v0 = vld [vmem:[%s409_s28] sm:$0xff]  ;;  %v2171_v12 = vmov 0.0|0.0   ;;  %v520_v14 = vld [vmem:[#allocation11 + $0x10] sm:$0xff]  ;;  %v521_v15 = vld [vmem:[#allocation11 + $0x18] sm:$0xff]  ;;  %vm2172_vm1 = vmmov 0  }
  0xbc   : > { %2135 = vsyncadd (%p2701_p9), [#allocation12], 4294966272  ;;  %v480_v1 = vsel %vm479_vm0, %v2507_v0, 0.0  ;;  %v518_v7 = vld [vmem:[#allocation11] sm:$0xff]  ;;  %v519_v8 = vld [vmem:[#allocation11 + $0x8] sm:$0xff]  ;;  %1773 = vmatprep.subr.bf16.mxu0 %v2171_v12  ;;  %1779 = vmatprep.subr.bf16.mxu1 %v2171_v12  ;;  %v1777_v17 = vpack.c.bf16 %v521_v15, %v520_v14  ;;  %v2173_v19 = vmov 0.0  }
  0xbd   : > { %481 = vadd.xlane.f32.xlu0 %v480_v1  ;;  %v612_v9 = vld [vmem:[#allocation10] sm:$0xff]  ;;  %v1774_v10 = vpack.c.bf16 %v519_v8, %v518_v7  ;;  %v613_v11 = vld [vmem:[#allocation10 + $0x8] sm:$0xff]  ;;  %v614_v16 = vld [vmem:[#allocation10 + $0x10] sm:$0xff]  ;;  %1708 = vmatprep.mubr.msk.f32.mxu0 %vm2172_vm1, %v2173_v19  ;;  %s2702_s30 = sld [smem:[#allocation24_spill]]  ;;  %vm602_vm4 = vcmask 523264   ;;  %s2174_s27 = smov 120  }
  0xbe   : > { %v1780_v13 = vpack.c.bf16 %v613_v11, %v612_v9  ;;  %v615_v18 = vld [vmem:[#allocation10 + $0x18] sm:$0xff]  ;;  %1719 = vmatprep.mubr.msk.f32.mxu1 %vm2172_vm1, %v2173_v19  ;;  %v1645_v29 = vld [vmem:[%s2660_s2] ss:$0 sm:$0xff]  ;;  %vm698_vm5 = vcmask 64512   ;;  %s2175_s22 = smov 112   ;;  %s2176_s16 = smov 104  }
  0xbf   : > { %1775 = vmatpush3.bf16.msra.mxu0 %v1774_v10  ;;  %v1783_v20 = vpack.c.bf16 %v615_v18, %v614_v16  ;;  %v1646_v32 = vld [vmem:[%s2661_s3] ss:$0 sm:$0xff]  ;;  %v609_v51 = vld [vmem:[%s418_s13] sm:$0xff]  ;;  %s2177_s29 = smov 88   ;;  %s2178_s28 = smov 96   ;;  %vm1038_vm7 = vcmask 130112  }
  0xc0   : > { %1781 = vmatpush3.bf16.msra.mxu1 %v1780_v13  ;;  %1776 = vmatprep.subr.bf16.mxu0 %v2171_v12  ;;  %v1647_v36 = vld [vmem:[%s2665_s7] ss:$0 sm:$0xff]  ;;  %vm610_vm6 = vcmp.eq.f32.partialorder %v609_v51, 0.0  ;;  %s2179_s23 = smov 72   ;;  %s2180_s25 = smov 80   ;;  %vm1213_vm8 = vcmask 195712  }
  0xc1   : > { %1782 = vmatprep.subr.bf16.mxu1 %v2171_v12  ;;  %v611_v53 = vsel %vm610_vm6, -1e+09, %v2173_v19  ;;  %s2181_s13 = smov 8   ;;  %s2182_s19 = smov 16   ;;  %vm1388_vm9 = vcmask 261312  }
  0xc2   : > { %s2703_s21 = sld [smem:[#allocation21_spill]]  ;;  %s2183_s5 = smov 24  }
  0xc3   : > { %1778 = vmatpush3.bf16.msra.mxu0 %v1777_v17  ;;  %v1649_v37 = vld [vmem:[%s2702_s30] ss:$0 sm:$0xff]  ;;  %s2704_s4 = sld [smem:[#allocation27_spill]]  ;;  %s471_s8 = scalar_lea.vmem [#allocation14], %s2485_s6 }
  0xc4   : > { %1784 = vmatpush3.bf16.msra.mxu1 %v1783_v20  ;;  %1732 = vmatprep.subr.mxu0 %v2173_v19  ;;  %s1492_s30 = sshll.u32 %s471_s8, 4  ;;  %p2707_p2 = scmp.ne.s32.totalorder %s2694_s9, 0  ;;  %s2610_s30 = int_to_ptr.vmem [resolvable:$true] %s1492_s30 }
  0xc5   : > { %1722 = vmatprep.subr.mxu1 %v2173_v19  ;;  %s2184_s6 = smov [#allocation14]  }
  0xc8   : > { %s1666_s11 = sshll.u32 %s2703_s21, 7 }
 0x14a   : > { %v482_v2 = vpop.xlane.xlu0 %481 }
 0x14b   : > { %v484_v3 = vmul.f32 0.03125, %v482_v2 }
 0x14d   : > { %v485_v4 = vsub.f32 %v2507_v0, %v484_v3 }
 0x14f   : > { %v486_v5 = vmul.f32 %v485_v4, %v485_v4  ;;  %v505_v30 = vmul.f32 %v1645_v29, %v485_v4 }
 0x151   : > { %v487_v6 = vsel %vm479_vm0, %v486_v5, 0.0 }
 0x152   : > { %488 = vadd.xlane.f32.xlu0 %v487_v6 }
 0x1df   : > { %v489_v21 = vpop.xlane.xlu0 %488 }
 0x1e0   : > { %v491_v22 = vmul.f32 0.032258064, %v489_v21 }
 0x1e2   : > { %1904 = vrsqrt.f32 %v491_v22  ;;  %vm494_vm2 = vcmp.eq.f32.partialorder %v491_v22, inf  ;;  %v497_v25 = vand.u32 2147483648, %v491_v22  ;;  %vm496_vm3 = vcmp.eq.f32.partialorder %v491_v22, 0.0 }
 0x1ec   : > { %v1905_v23 = vpop.eup %1904 }
 0x1ed   : > { %v493_v24 = vmul.f32 %v1905_v23, %v491_v22 }
 0x1ef   : > { %v495_v26 = vsel %vm494_vm2, %v491_v22, %v493_v24 }
 0x1f0   : > { %v498_v27 = vsel %vm496_vm3, %v497_v25, %v495_v26 }
 0x1f1   : > { %v506_v28 = vadd.f32 1e-06, %v498_v27 }
 0x1f3   : > { %1906 = vrcp.f32 %v506_v28 }
 0x1fd   : > { %v1907_v31 = vpop.eup %1906 }
 0x1fe   : > { %v508_v33 = vmul.f32 %v1907_v31, %v505_v30 }
 0x200   : > { %v515_v34 = vadd.f32 %v1646_v32, %v508_v33 }
 0x202   : > { %516 = vst.msk [vmem:[#allocation2] sm:$0xff] %vm479_vm0, %v515_v34 }
 0x209   : > { %v517_v35 = vld [vmem:[#allocation2] sm:$0xff] }
 0x20a   : > { %1709 = vmatmul.mubr.msk.f32.vlgmr.msra.gmra.mrb[0].mxu0 %vm479_vm0, %v517_v35  ;;  %1720 = vmatmul.mubr.msk.f32.vlgmr.msra.gmra.mrb[0].mxu1 %vm479_vm0, %v517_v35 }
 0x20b   : > { %1724 = vmatprep.mubr.msk.f32.mxu1 %vm2172_vm1, %v2173_v19  ;;  %1734 = vmatprep.mubr.msk.f32.mxu0 %vm2172_vm1, %v2173_v19 }
 0x2dd   : > { %v598_v38 = vpop.f32.mrb[0].mxu0  ;;  %v693_v39 = vpop.f32.mrb[0].mxu1 }
 0x2de   : > { %v599_v40 = vadd.f32 %v1647_v36, %v598_v38  ;;  %v694_v41 = vadd.f32 %v1649_v37, %v693_v39  ;;  %v1710_v42 = vpop.f32.mrb[1].mxu0  ;;  %v1721_v43 = vpop.f32.mrb[1].mxu1 }
 0x2e0   : > { %603 = vst.msk [vmem:[#allocation3] sm:$0xff] %vm602_vm4, %v599_v40  ;;  %866 = vrot.lane.b32.xlu1 %v694_v41, %s2174_s27 }
 0x2e7   : > { %v2542_v44 = vld [vmem:[#allocation3] sm:$0xff] }
 0x2e8   : > { %1044 = vrot.lane.b32.xlu0 %v2542_v44, %s2175_s22  ;;  %869 = vrot.lane.b32.xlu1 %v2542_v44, %s2174_s27 }
 0x2e9   : > { %1723 = vmatpush3.xpose.msk.msra.mxu1 %vm698_vm5, %v2542_v44 }
 0x2ea   : > { %1727 = vmatprep.subr.mxu1 %v2173_v19 }
 0x2ec   : > { %1725 = vmatmul.mubr.msk.f32.vlgmr.msra.gmra.mrb[2].mxu1 %vm698_vm5, %v694_v41  ;;  %1041 = vrot.lane.b32.xlu1 %v694_v41, %s2175_s22 }
 0x2ed   : > { %1729 = vmatprep.mubr.msk.f32.mxu1 %vm2172_vm1, %v2173_v19 }
 0x2f0   : > { %1219 = vrot.lane.b32.xlu1 %v2542_v44, %s2176_s16 }
 0x2f4   : > { %1216 = vrot.lane.b32.xlu1 %v694_v41, %s2176_s16  ;;  %s2705_s16 = sld [smem:[#allocation28_spill]] }
 0x352   : > { %v867_v45 = vpop.permute.xlu1 %866 }
 0x35a   : > { %v870_v46 = vpop.permute.xlu1 %869  ;;  %v1045_v47 = vpop.permute.xlu0 %1044 }
 0x35b   : > { %1733 = vmatpush3.xpose.msk.msra.mxu0 %vm698_vm5, %v870_v46  ;;  %v1393_v46 = vld [vmem:[#allocation13 + $0x10] sm:$0xff] }
 0x35c   : > { %1742 = vmatprep.subr.mxu0 %v2173_v19 }
 0x35e   : > { %1735 = vmatmul.mubr.msk.f32.vlgmr.msra.gmra.mrb[2].mxu0 %vm698_vm5, %v867_v45  ;;  %v1042_v48 = vpop.permute.xlu1 %1041 }
 0x35f   : > { %1743 = vmatpush3.xpose.msk.msra.mxu0 %vm698_vm5, %v1045_v47  ;;  %1744 = vmatprep.mubr.msk.f32.mxu0 %vm2172_vm1, %v2173_v19  ;;  %v1394_v47 = vld [vmem:[#allocation13 + $0x18] sm:$0xff] }
 0x360   : > { %1752 = vmatprep.subr.mxu0 %v2173_v19 }
 0x362   : > { %1745 = vmatmul.mubr.msk.f32.vlgmr.msra.gmra.mrb[4].mxu0 %vm698_vm5, %v1042_v48  ;;  %v1220_v49 = vpop.permute.xlu1 %1219 }
 0x363   : > { %1753 = vmatpush3.xpose.msk.msra.mxu0 %vm698_vm5, %v1220_v49  ;;  %1754 = vmatprep.mubr.msk.f32.mxu0 %vm2172_vm1, %v2173_v19 }
 0x364   : > { %1785 = vmatprep.subr.bf16.mxu0 %v2171_v12 }
 0x366   : > { %v1217_v50 = vpop.permute.xlu1 %1216 }
 0x367   : > { %1755 = vmatmul.mubr.msk.f32.vlgmr.msra.gmra.mrb[6].mxu0 %vm698_vm5, %v1217_v50 }
 0x368   : > { %1770 = vmatprep.mubr.msk.f32.mxu0 %vm2172_vm1, %v2173_v19 }
 0x3bf   : > { %v771_v52 = vpop.f32.mrb[2].mxu1 }
 0x3c0   : > { %v775_v54 = vmul.f32 0.35355338, %v771_v52  ;;  %v1726_v55 = vpop.f32.mrb[3].mxu1  ;;  %v1789_v52 = vpack.c.bf16 %v1394_v47, %v1393_v46 }
 0x3c2   : > { %v776_v56 = vadd.f32 %v775_v54, %v611_v53 }
 0x3c4   : > { %v777_v57 = vsel %vm698_vm5, %v776_v56, -inf }
 0x3c5   : > { %778 = vmax.xlane.f32.xlu1 %v777_v57 }
 0x3d6   : > { %956 = vrot.lane.b32.xlu1 %v2542_v44, %s2177_s29  ;;  %s2706_s29 = smov %s2705_s16 }
 0x431   : > { %v941_v58 = vpop.f32.mrb[2].mxu0 }
 0x432   : > { %v945_v59 = vmul.f32 0.35355338, %v941_v58  ;;  %v1736_v60 = vpop.f32.mrb[3].mxu0 }
 0x434   : > { %v946_v61 = vadd.f32 %v945_v59, %v611_v53 }
 0x435   : > { %v1116_v62 = vpop.f32.mrb[4].mxu0 }
 0x436   : > { %v1120_v63 = vmul.f32 0.35355338, %v1116_v62  ;;  %v1746_v1 = vpop.f32.mrb[5].mxu0  ;;  %v947_v2 = vsel %vm698_vm5, %v946_v61, -inf }
 0x437   : > { %948 = vmax.xlane.f32.xlu0 %v947_v2  ;;  %v1663_v1 = vld [vmem:[%s2704_s4] ss:$0 sm:$0xff] }
 0x438   : > { %v1121_v3 = vadd.f32 %v1120_v63, %v611_v53 }
 0x43a   : > { %v1291_v4 = vpop.f32.mrb[6].mxu0  ;;  %v1122_v5 = vsel %vm698_vm5, %v1121_v3, -inf }
 0x43b   : > { %v1295_v6 = vmul.f32 0.35355338, %v1291_v4  ;;  %1123 = vmax.xlane.f32.xlu1 %v1122_v5  ;;  %v1756_v7 = vpop.f32.mrb[7].mxu0 }
 0x43d   : > { %v1296_v8 = vadd.f32 %v1295_v6, %v611_v53 }
 0x43f   : > { %v1297_v9 = vsel %vm698_vm5, %v1296_v8, -inf }
 0x440   : > { %1298 = vmax.xlane.f32.xlu1 %v1297_v9 }
 0x44d   : > { %786 = vrot.lane.b32.xlu0 %v2542_v44, %s2178_s28  ;;  %s2608_s28 = scalar_lea.hbm %s2705_s16, %s1666_s11 }
 0x451   : > { %1306 = vrot.lane.b32.xlu0 %v2542_v44, %s2179_s23  ;;  %1131 = vrot.lane.b32.xlu1 %v2542_v44, %s2180_s25  ;;  %v1392_v44 = vld [vmem:[#allocation13 + $0x8] sm:$0xff]  ;;  %s1478_s23 = scalar_lea.sflag [#allocation7], %s2482_s20  ;;  %s2068_s25 = scalar_lea.vmem %s2610_s30, 128 }
 0x452   : > { %v779_v10 = vpop.xlane.xlu1 %778  ;;  %p2069_p0 = scmp.ne.s32.totalorder %s2610_s30, %s2068_s25 }
 0x453   : > { %v780_v11 = vsub.f32 %v776_v56, %v779_v10 }
 0x454   : > { %p2070_p4 = pnand %p2069_p0, %p2707_p2 }
 0x455   : > { %v781_v13 = vmul.f32 1.442695, %v780_v11 }
 0x456   : > { %v957_v14 = vpop.permute.xlu1 %956  ;;  %p2071_p8 = pneg %p2070_p4 }
 0x457   : > { %1908 = vpow2.f32 %v781_v13 }
 0x461   : > { %v1909_v21 = vpop.eup %1908 }
 0x462   : > { %v783_v33 = vsel %vm698_vm5, %v1909_v21, 0.0 }
 0x4c4   : > { %v949_v15 = vpop.xlane.xlu0 %948 }
 0x4c5   : > { %v950_v16 = vsub.f32 %v946_v61, %v949_v15 }
 0x4c7   : > { %v951_v17 = vmul.f32 1.442695, %v950_v16 }
 0x4c8   : > { %v787_v18 = vpop.permute.xlu0 %786  ;;  %v1124_v20 = vpop.xlane.xlu1 %1123 }
 0x4c9   : > { %1910 = vpow2.f32 %v951_v17  ;;  %v1125_v22 = vsub.f32 %v1121_v3, %v1124_v20  ;;  %1728 = vmatpush3.msra.mxu1 %v787_v18 }
 0x4ca   : > { %1730 = vmatmul.mubr.msk.f32.vlgmr.msra.gmra.mrb[4].mxu1 %vm698_vm5, %v1909_v21  ;;  %1737 = vmatprep.subr.mxu1 %v2173_v19 }
 0x4cb   : > { %v1126_v23 = vmul.f32 1.442695, %v1125_v22  ;;  %1738 = vmatpush3.msra.mxu1 %v957_v14  ;;  %1739 = vmatprep.mubr.msk.f32.mxu1 %vm2172_vm1, %v2173_v19 }
 0x4cc   : > { %1747 = vmatprep.subr.mxu1 %v2173_v19  ;;  %v1307_v31 = vpop.permute.xlu0 %1306 }
 0x4cd   : > { %1912 = vpow2.f32 %v1126_v23  ;;  %v1299_v24 = vpop.xlane.xlu1 %1298 }
 0x4ce   : > { %v1300_v25 = vsub.f32 %v1296_v8, %v1299_v24 }
 0x4d0   : > { %v1301_v26 = vmul.f32 1.442695, %v1300_v25 }
 0x4d1   : > { %v1132_v28 = vpop.permute.xlu1 %1131 }
 0x4d2   : > { %1914 = vpow2.f32 %v1301_v26 }
 0x4d3   : > { %v1911_v27 = vpop.eup %1910 }
 0x4d4   : > { %1740 = vmatmul.mubr.msk.f32.vlgmr.msra.gmra.mrb[6].mxu1 %vm698_vm5, %v1911_v27  ;;  %v953_v29 = vsel %vm698_vm5, %v1911_v27, 0.0 }
 0x4d5   : > { %1748 = vmatpush3.msra.mxu1 %v1132_v28  ;;  %954 = vadd.xlane.f32.xlu1 %v953_v29 }
 0x4d6   : > { %1749 = vmatprep.mubr.msk.f32.mxu1 %vm2172_vm1, %v2173_v19  ;;  %1757 = vmatprep.subr.mxu1 %v2173_v19 }
 0x4d7   : > { %v1913_v30 = vpop.eup %1912 }
 0x4d8   : > { %1750 = vmatmul.mubr.msk.f32.vlgmr.msra.gmra.mrb[8].mxu1 %vm698_vm5, %v1913_v30  ;;  %v1128_v32 = vsel %vm698_vm5, %v1913_v30, 0.0 }
 0x4d9   : > { %1758 = vmatpush3.msra.mxu1 %v1307_v31  ;;  %1129 = vadd.xlane.f32.xlu0 %v1128_v32 }
 0x4da   : > { %784 = vadd.xlane.f32.xlu1 %v783_v33  ;;  %1759 = vmatprep.mubr.msk.f32.mxu1 %vm2172_vm1, %v2173_v19  ;;  %v1391_v19 = vld [vmem:[#allocation13] sm:$0xff] }
 0x4db   : > { %v1786_v45 = vpack.c.bf16 %v1392_v44, %v1391_v19 }
 0x4dc   : > { %v1915_v34 = vpop.eup %1914 }
 0x4dd   : > { %1760 = vmatmul.mubr.msk.f32.vlgmr.msra.gmra.mrb[10].mxu1 %vm698_vm5, %v1915_v34  ;;  %v1303_v35 = vsel %vm698_vm5, %v1915_v34, 0.0  ;;  %1787 = vmatpush3.bf16.msra.mxu0 %v1786_v45 }
 0x4de   : > { %1304 = vadd.xlane.f32.xlu0 %v1303_v35  ;;  %1788 = vmatprep.subr.bf16.mxu0 %v2171_v12 }
 0x4e1   : > { %1790 = vmatpush3.bf16.msra.mxu0 %v1789_v52 }
 0x562   : > { %v955_v36 = vpop.xlane.xlu1 %954 }
 0x566   : > { %v1130_v39 = vpop.xlane.xlu0 %1129 }
 0x567   : > { %v785_v37 = vpop.xlane.xlu1 %784 }
 0x568   : > { %1916 = vrcp.f32 %v785_v37 }
 0x569   : > { %1918 = vrcp.f32 %v955_v36 }
 0x56a   : > { %1920 = vrcp.f32 %v1130_v39 }
 0x56b   : > { %v1305_v43 = vpop.xlane.xlu0 %1304 }
 0x56c   : > { %1922 = vrcp.f32 %v1305_v43 }
 0x572   : > { %v1917_v38 = vpop.eup %1916 }
 0x573   : > { %v1919_v48 = vpop.eup %1918 }
 0x574   : > { %v1921_v53 = vpop.eup %1920 }
 0x576   : > { %v1923_v57 = vpop.eup %1922 }
 0x59d   : > { %v858_v40 = vpop.f32.mrb[4].mxu1 }
 0x59e   : > { %v863_v41 = vmul.f32 %v1917_v38, %v858_v40  ;;  %v1731_v42 = vpop.f32.mrb[5].mxu1 }
 0x5a0   : > { %864 = vst.msk [vmem:[#allocation4] sm:$0xff] %vm698_vm5, %v863_v41 }
 0x5a7   : > { %v1028_v49 = vpop.f32.mrb[6].mxu1 }
 0x5a8   : > { %v1033_v50 = vmul.f32 %v1919_v48, %v1028_v49  ;;  %v1741_v51 = vpop.f32.mrb[7].mxu1 }
 0x5aa   : > { %1035 = vrot.lane.b32.xlu0 %v1033_v50, %s2181_s13  ;;  %s2072_s13 = sshll.u32 %s2184_s6, 4  ;;  %s2073_s13 = int_to_ptr.vmem [resolvable:$false] %s2072_s13 }
 0x5ab   : > { %v1203_v54 = vpop.f32.mrb[8].mxu1  ;;  %p2075_p1 = scmp.lt.s32.totalorder %s2610_s30, %s2073_s13 }
 0x5ac   : > { %v1208_v55 = vmul.f32 %v1921_v53, %v1203_v54  ;;  %v1751_v56 = vpop.f32.mrb[9].mxu1 }
 0x5ae   : > { %1210 = vrot.lane.b32.xlu1 %v1208_v55, %s2182_s19  ;;  %s2074_s19 = scalar_lea.vmem %s2073_s13, 256 }
 0x5af   : > { %p2076_p13 = scmp.lt.s32.totalorder %s2074_s19, %s2068_s25 }
 0x5b0   : > { %v1378_v58 = vpop.f32.mrb[10].mxu1 }
 0x5b1   : > { %v1383_v59 = vmul.f32 %v1923_v57, %v1378_v58  ;;  %v1761_v60 = vpop.f32.mrb[11].mxu1  ;;  %p2077_p3 = por %p2076_p13, %p2075_p1 }
 0x5b3   : > { %1385 = vrot.lane.b32.xlu1 %v1383_v59, %s2183_s5  ;;  %p2078_p5 = pnand %p2077_p3, %p2071_p8 }
 0x61c   : > { %v1036_v61 = vpop.permute.xlu0 %1035 }
 0x61d   : > { %1039 = vst.msk [vmem:[#allocation4] sm:$0xff] %vm1038_vm7, %v1036_v61 }
 0x620   : > { %v1211_v12 = vpop.permute.xlu1 %1210 }
 0x621   : > { %1214 = vst.msk [vmem:[#allocation4] sm:$0xff] %vm1213_vm8, %v1211_v12 }
 0x625   : > { %v1386_v62 = vpop.permute.xlu1 %1385 }
 0x626   : > { %1389 = vst.msk [vmem:[#allocation4] sm:$0xff] %vm1388_vm9, %v1386_v62 }
 0x62d   : > { %v1390_v63 = vld [vmem:[#allocation4] sm:$0xff] }
 0x62e   : > { %1771 = vmatmul.mubr.msk.f32.vlgmr.msra.gmra.mrb[8].mxu0 %vm479_vm0, %v1390_v63 }
 0x701   : > { %v1471_v2 = vpop.f32.mrb[8].mxu0 }
 0x702   : > { %v1472_v3 = vadd.f32 %v1663_v1, %v1471_v2  ;;  %v1772_v4 = vpop.f32.mrb[9].mxu0 }
 0x704   : > { %v1475_v5 = vadd.f32 %v1472_v3, %v2507_v0 }
 0x706   : > { %1476 = vst.msk [vmem:[%s471_s8] sm:$0xff] %vm479_vm0, %v1475_v5 }
 0x707   : > { %2081 = shalt.err (!%p2078_p5)
}
 0x708   : > { %s2082_s20 = scalar_lea.hbm %s2608_s28, 128  ;;  %s2086_s24 = scalar_lea.hbm %s2706_s29, 256 }
 0x709   : > { %p2083_p6 = scmp.ne.s32.totalorder %s2608_s28, %s2082_s20  ;;  %p2087_p12 = scmp.lt.u32.totalorder %s2608_s28, %s2706_s29 }
 0x70a   : > { %p2088_p11 = scmp.lt.u32.totalorder %s2086_s24, %s2082_s20  ;;  %p2090_p0 = scmp.lt.u32.totalorder %s2082_s20, %s2608_s28 }
 0x70b   : > { %p2084_p10 = pnand %p2083_p6, %p2707_p2 }
 0x70c   : > { %p2089_p9 = por %p2088_p11, %p2087_p12 }
 0x70d   : > { %p2085_p7 = pneg %p2084_p10 }
 0x70e   : > { %p2091_p4 = por %p2090_p0, %p2089_p9 }
 0x710   : > { %p2092_p8 = pnand %p2091_p4, %p2085_p7 }
 0x712   : > { %2095 = shalt.err (!%p2092_p8)
}
 0x713   : > { %1807 = dma.vmem_to_hbm [thread:$0]  (%p2707_p2), %s2610_s30, 128, %s2608_s28, %s1478_s23  }
 0x714 PF: > { %s2708_s11 = sld [smem:[#allocation20_spill]]  ;;  %s2709_s8 = sld [smem:[#allocation22_spill]] }
 0x715   : > { %p2711_p13 = scmp.ge.s32.totalorder %s2162_s18, 2 }
 0x71a   : > { %s1504_s27 = sand.u32 1, %s2708_s11   ;;  %p2710_p1 = scmp.ne.s32.totalorder %s2709_s8, 0 }
 0x71b   : > { %s1505_s22 = scalar_lea.sflag [#allocation7], %s1504_s27 }
 0x71c   : > { %p1827_p3 = pnand %p2711_p13, %p2710_p1 }
 0x71e   : > { %2137 = dma.done.wait (!%p1827_p3), %s1505_s22, 128  }
 0x71f   : > { %2139 = vsyncadd (!%p1827_p3), %s1505_s22, 4294967168  ;;  %s30_s18 = sadd.s32 1, %s2162_s18   ;;  %s2712_s13 = smov %s2146_s14 }
 0x720   : > { %p27_p5 = scmp.ge.s32.totalorder %s30_s18, 4   ;;  %s2713_s14 = smov %s2150_s15 }
 0x721   : > { %s2714_s15 = smov %s2410_s12  ;;  %s2715_s16 = smov %s2158_s17 }
 0x722   : > { %s2716_s17 = smov %s2718_s26  ;;  %29 = sbr.rel (!%p27_p5) target bundleno = 16 (0x10), region = 136 }
 0x729   :  { %1510 = vsyncpa [#allocation6], 1 }
 0x72a   :  { %1512 = vsyncpa [#allocation6 + $0x1], 1 }
 0x72b   :  { %1513 = vsyncpa [#allocation9], 1 }
 0x72c   :  { %1515 = vsyncpa [#allocation9 + $0x1], 1 }
 0x72d   :  { %1516 = vsyncpa [#allocation12], 1 }
 0x72e   :  { %1517 = vsyncpa [#allocation7], 1 }
 0x72f   :  { %1519 = vsyncpa [#allocation7 + $0x1], 1 }

</bundles_post_ra>
